<compile_context>
chip_gen: v7x
topology: tpu7x:2x2x1
jax: 0.10.0
libtpu: 0.0.40
codegen_flags: <defaults>
</compile_context>

<pallas_src>
import jax
import jax.numpy as jnp
from jax.experimental import pallas as pl
from jax.experimental.pallas import tpu as pltpu


def _mlp_kernel(xt_ref, w1_ref, b1_ref, w2_ref, b2_ref, out_ref):
    """Fused 2-layer MLP in transposed (feature-major, batch-on-lanes) layout.

    xt_ref : (1, TN)  input row, batch on the lane axis
    w1_ref : (H, 1)   hidden-layer weight column (n_feature == 1)
    b1_ref : (H, 1)   hidden bias column
    w2_ref : (H, 1)   output-layer weight column (n_output == 1)
    b2_ref : (1, 1)   output bias
    out_ref: (1, TN)  lane-dense output (batch on lanes)
    """
    xt = xt_ref[...]                                          # (1, TN)
    # Layer 1: K=1 outer product -> VPU broadcast multiply + bias + ReLU.
    h = jnp.maximum(w1_ref[...] * xt + b1_ref[...], 0.0)      # (H, TN)
    # Layer 2: N=1 contraction -> VPU multiply + cross-sublane (XLU) reduce.
    y = jnp.sum(w2_ref[...] * h, axis=0, keepdims=True)       # (1, TN)
    out_ref[...] = (y + b2_ref[...]).astype(out_ref.dtype)


def net_forward(x, w1, b1, w2, b2, *, lane_tile=512):
    """Forward pass of Net: relu(x @ w1 + b1) @ w2 + b2.

    x : (N, 1); w1 : (1, H); b1 : (1, H); w2 : (H, 1); b2 : (1, 1) -> (N, 1)
    """
    n, f = x.shape
    h_dim, o = w2.shape
    assert f == 1 and o == 1, "kernel specialized for n_feature=1, n_output=1"
    assert h_dim % 8 == 0, "hidden width must be sublane (8) aligned"
    # TODO(synk): general n_feature / n_output would need a small contraction
    # loop (or MXU path) instead of the pure VPU broadcast/reduce used here.

    # --- wrapper-side layout plumbing (lane-dense, 128-aligned batch) -------
    n_pad = ((n + 127) // 128) * 128                 # batch -> multiple of 128
    tn = min(lane_tile, n_pad)                       # lane tile (multiple of 128)
    n_pad = ((n_pad + tn - 1) // tn) * tn
    xt = jnp.zeros((1, n_pad), x.dtype).at[:, :n].set(x.T)    # (1, Npad)
    w1c = w1.T.reshape(h_dim, 1)                     # (H, 1)
    b1c = b1.reshape(h_dim, 1)                       # (H, 1)
    w2c = w2.reshape(h_dim, 1)                       # (H, 1)
    b2c = b2.reshape(1, 1)                           # (1, 1)

    const = lambda shape: pl.BlockSpec(shape, lambda i: (0, 0))
    yt = pl.pallas_call(
        _mlp_kernel,
        out_shape=jax.ShapeDtypeStruct((1, n_pad), x.dtype),
        grid=(n_pad // tn,),
        in_specs=[
            pl.BlockSpec((1, tn), lambda i: (0, i)),   # xt: batch-tiled on lanes
            const((h_dim, 1)),                          # w1 (VMEM-resident)
            const((h_dim, 1)),                          # b1
            const((h_dim, 1)),                          # w2
            const((1, 1)),                              # b2
        ],
        out_specs=pl.BlockSpec((1, tn), lambda i: (0, i)),
        compiler_params=pltpu.CompilerParams(
            dimension_semantics=("parallel",)),
    )(xt, w1c, b1c, w2c, b2c)

    # Drop the lane padding and return in the original (N, 1) layout.
    return yt[:, :n].T


def init_params(key, n_feature, n_hidden, n_output, dtype=jnp.float32):
    """Deterministic init mimicking torch.nn.Linear's U(-1/sqrt(fan_in), +)."""
    k1, k2, k3, k4 = jax.random.split(key, 4)
    lim1 = 1.0 / (n_feature ** 0.5)
    lim2 = 1.0 / (n_hidden ** 0.5)
    w1 = jax.random.uniform(k1, (n_feature, n_hidden), dtype, -lim1, lim1)
    b1 = jax.random.uniform(k2, (1, n_hidden), dtype, -lim1, lim1)
    w2 = jax.random.uniform(k3, (n_hidden, n_output), dtype, -lim2, lim2)
    b2 = jax.random.uniform(k4, (1, n_output), dtype, -lim2, lim2)
    return w1, b1, w2, b2


if __name__ == "__main__":
    # Match the reference script: x = linspace(-1, 1, 100)[:, None]
    n_feature, n_hidden, n_output = 1, 32, 1
    x = jnp.expand_dims(jnp.linspace(-1.0, 1.0, 100, dtype=jnp.float32), axis=1)

    key = jax.random.PRNGKey(0)
    w1, b1, w2, b2 = init_params(key, n_feature, n_hidden, n_output)

    y = net_forward(x, w1, b1, w2, b2)
    jax.block_until_ready(y)

    # Correctness check against plain-JAX reference of the same forward pass.
    y_ref = jnp.maximum(x @ w1 + b1, 0.0) @ w2 + b2
    assert y.shape == (100, n_output)
    assert jnp.allclose(y, y_ref, atol=1e-5, rtol=1e-5)

    print("KERNEL_OK")
</pallas_src>

<mosaic_0001>
module attributes {stable_mosaic.version = 11 : i64} {
  func.func @_mlp_kernel(%arg0: i32, %arg1: memref<1x128xf32, #tpu.memory_space<vmem>>, %arg2: memref<32x1xf32, #tpu.memory_space<vmem>>, %arg3: memref<32x1xf32, #tpu.memory_space<vmem>>, %arg4: memref<32x1xf32, #tpu.memory_space<vmem>>, %arg5: memref<1x1xf32, #tpu.memory_space<vmem>>, %arg6: memref<1x128xf32, #tpu.memory_space<vmem>>) attributes {dimension_semantics = [#tpu.dimension_semantics<parallel>], iteration_bounds = array<i64: 1>, scalar_prefetch = 0 : i64, scratch_operands = 0 : i64, tpu.core_type = #tpu.core_type<tc>, window_params = [{transform_indices = @transform_0, window_bounds = array<i64: 1, 128>}, {pipeline_mode = #tpu.pipeline_mode<synchronous>, transform_indices = @transform_1, window_bounds = array<i64: 32, 1>}, {pipeline_mode = #tpu.pipeline_mode<synchronous>, transform_indices = @transform_2, window_bounds = array<i64: 32, 1>}, {pipeline_mode = #tpu.pipeline_mode<synchronous>, transform_indices = @transform_3, window_bounds = array<i64: 32, 1>}, {pipeline_mode = #tpu.pipeline_mode<synchronous>, transform_indices = @transform_4, window_bounds = array<i64: 1, 1>}, {transform_indices = @transform_5, window_bounds = array<i64: 1, 128>}]} {
    %c0 = arith.constant 0 : index
    %c0_0 = arith.constant 0 : index
    %0 = vector.load %arg1[%c0, %c0_0] : memref<1x128xf32, #tpu.memory_space<vmem>>, vector<1x128xf32>
    %c0_1 = arith.constant 0 : index
    %c0_2 = arith.constant 0 : index
    %1 = vector.load %arg2[%c0_1, %c0_2] : memref<32x1xf32, #tpu.memory_space<vmem>>, vector<32x1xf32>
    %2 = vector.broadcast %1 : vector<32x1xf32> to vector<32x128xf32>
    %3 = vector.broadcast %0 : vector<1x128xf32> to vector<32x128xf32>
    %4 = arith.mulf %2, %3 : vector<32x128xf32>
    %c0_3 = arith.constant 0 : index
    %c0_4 = arith.constant 0 : index
    %5 = vector.load %arg3[%c0_3, %c0_4] : memref<32x1xf32, #tpu.memory_space<vmem>>, vector<32x1xf32>
    %6 = vector.broadcast %5 : vector<32x1xf32> to vector<32x128xf32>
    %7 = arith.addf %4, %6 : vector<32x128xf32>
    %cst = arith.constant 0.000000e+00 : f32
    %8 = vector.broadcast %cst : f32 to vector<32x128xf32>
    %9 = arith.maximumf %7, %8 : vector<32x128xf32>
    %c0_5 = arith.constant 0 : index
    %c0_6 = arith.constant 0 : index
    %10 = vector.load %arg4[%c0_5, %c0_6] : memref<32x1xf32, #tpu.memory_space<vmem>>, vector<32x1xf32>
    %11 = vector.broadcast %10 : vector<32x1xf32> to vector<32x128xf32>
    %12 = arith.mulf %11, %9 : vector<32x128xf32>
    %cst_7 = arith.constant dense<0.000000e+00> : vector<128xf32>
    %13 = vector.multi_reduction <add>, %12, %cst_7 [0] : vector<32x128xf32> to vector<128xf32>
    %14 = vector.shape_cast %13 : vector<128xf32> to vector<1x128xf32>
    %c0_8 = arith.constant 0 : index
    %c0_9 = arith.constant 0 : index
    %15 = vector.load %arg5[%c0_8, %c0_9] : memref<1x1xf32, #tpu.memory_space<vmem>>, vector<1x1xf32>
    %16 = vector.broadcast %15 : vector<1x1xf32> to vector<1x128xf32>
    %17 = arith.addf %14, %16 : vector<1x128xf32>
    %c0_10 = arith.constant 0 : index
    %c0_11 = arith.constant 0 : index
    %18 = vector.load %arg6[%c0_10, %c0_11] : memref<1x128xf32, #tpu.memory_space<vmem>>, vector<1x128xf32>
    tpu.vector_store %arg6[%c0_10, %c0_11], %17 {strides = array<i32>} : memref<1x128xf32, #tpu.memory_space<vmem>>, vector<1x128xf32>,
    return
  }
  func.func @transform_0(%arg0: i32) -> (i32, i32) {
    %c0_i32 = arith.constant 0 : i32
    %c0_i32_0 = arith.constant 0 : i32
    return %c0_i32, %arg0 : i32, i32
  }
  func.func @transform_1(%arg0: i32) -> (i32, i32) {
    %c0_i32 = arith.constant 0 : i32
    %c0_i32_0 = arith.constant 0 : i32
    %c0_i32_1 = arith.constant 0 : i32
    return %c0_i32, %c0_i32_0 : i32, i32
  }
  func.func @transform_2(%arg0: i32) -> (i32, i32) {
    %c0_i32 = arith.constant 0 : i32
    %c0_i32_0 = arith.constant 0 : i32
    %c0_i32_1 = arith.constant 0 : i32
    return %c0_i32, %c0_i32_0 : i32, i32
  }
  func.func @transform_3(%arg0: i32) -> (i32, i32) {
    %c0_i32 = arith.constant 0 : i32
    %c0_i32_0 = arith.constant 0 : i32
    %c0_i32_1 = arith.constant 0 : i32
    return %c0_i32, %c0_i32_0 : i32, i32
  }
  func.func @transform_4(%arg0: i32) -> (i32, i32) {
    %c0_i32 = arith.constant 0 : i32
    %c0_i32_0 = arith.constant 0 : i32
    %c0_i32_1 = arith.constant 0 : i32
    return %c0_i32, %c0_i32_0 : i32, i32
  }
  func.func @transform_5(%arg0: i32) -> (i32, i32) {
    %c0_i32 = arith.constant 0 : i32
    %c0_i32_0 = arith.constant 0 : i32
    return %c0_i32, %arg0 : i32, i32
  }
}

</mosaic_0001>

<bundles_post_ra>
// kernel: tpu_custom_call.1
= control target key start
LH: loop header
LB: loop body
LE: loop exit
PB: predicated region body
PF: predicated region fallthrough
CT: control target
= control target key end

     0   :  { %s268_s0 = inlined_call_operand.vmem [shape: f32[1,128], index: 0, kind: input, shape index: {}]   ;;  %s269_s1 = inlined_call_operand.vmem [shape: f32[32,1], index: 1, kind: input, shape index: {}]   ;;  %s270_s2 = inlined_call_operand.vmem [shape: f32[32,1], index: 2, kind: input, shape index: {}]   ;;  %s271_s3 = inlined_call_operand.vmem [shape: f32[32,1], index: 3, kind: input, shape index: {}]   ;;  %s272_s4 = inlined_call_operand.<no memory space> [shape: f32[1,1], index: 4, kind: input, shape index: {}]   ;;  %s273_s5 = inlined_call_operand.hbm [shape: f32[1,128], index: 5, kind: output, shape index: {}]  }
   0x1   :  { %v10_v0 = vstv %s272_s4 }
   0x2   :  { %11 = vst [vmem:[#allocation2] sm:$0x1] %v10_v0 }
   0x3   :  { %v26_v1 = vld [vmem:[%s269_s1 + $0x10] sm:$0xff]  ;;  %v24_v2 = vld [vmem:[%s269_s1] sm:$0xff]  ;;  %v182_v3 = vmov 0   ;;  %v25_v5 = vld [vmem:[%s269_s1 + $0x8] sm:$0xff] }
   0x4   :  { %157 = vset.pattern.permute.xlu1 %v182_v3  ;;  %156 = vset.pattern.permute.xlu0 %v182_v3  ;;  %v58_v4 = vld [vmem:[%s270_s2] sm:$0xff] }
   0x5   :  { %40 = vperm.xlu1 %157, %v26_v1   ;;  %30 = vperm.xlu0 %156, %v24_v2  }
   0x6   :  { %12 = vsyncpa [#allocation4], 0  ;;  %v27_v6 = vld [vmem:[%s269_s1 + $0x18] sm:$0xff]  ;;  %v59_v7 = vld [vmem:[%s270_s2 + $0x8] sm:$0xff]  ;;  %v133_v47 = vlaneseq }
   0x7   :  { %v61_v8 = vld [vmem:[%s270_s2 + $0x18] sm:$0xff]  ;;  %v60_v9 = vld [vmem:[%s270_s2 + $0x10] sm:$0xff]  ;;  %v91_v10 = vld [vmem:[%s271_s3 + $0x8] sm:$0xff] }
   0x8   :  { %v90_v11 = vld [vmem:[%s271_s3] sm:$0xff]  ;;  %v93_v12 = vld [vmem:[%s271_s3 + $0x18] sm:$0xff]  ;;  %v92_v13 = vld [vmem:[%s271_s3 + $0x10] sm:$0xff]  ;;  %v134_v50 = vshrl.u32 %v133_v47, 7 }
   0x9   :  { %64 = vperm.xlu1 %157, %v58_v4   ;;  %35 = vperm.xlu0 %156, %v25_v5   ;;  %v127_v14 = vld [vmem:[#allocation2] sm:$0x1] }
   0xa   :  { %v153_v19 = vld [vmem:[%s268_s0] ss:$0 sm:$0xff]  ;;  %v135_v52 = vsub.s32 0, %v134_v50  ;;  %s183_s0 = smov [#allocation3]  }
   0xb   :  { %s145_s3 = sshll.u32 %s183_s0, 4  ;;  %s146_s3 = int_to_ptr.vmem [resolvable:$true] %s145_s3 }
   0xc   :  { %s158_s18 = scalar_lea.vmem %s146_s3, 16  ;;  %s162_s19 = scalar_lea.vmem %s146_s3, 32 }
   0xd   :  { %45 = vperm.xlu1 %157, %v27_v6   ;;  %69 = vperm.xlu0 %156, %v59_v7   ;;  %p159_p0 = scmp.ne.s32.totalorder %s146_s3, %s158_s18  ;;  %p163_p1 = scmp.lt.s32.totalorder %s146_s3, %s146_s3 }
   0xe   :  { %p164_p2 = scmp.lt.s32.totalorder %s162_s19, %s158_s18 }
  0x10   :  { %p165_p3 = por %p164_p2, %p163_p1 }
  0x11   :  { %79 = vperm.xlu1 %157, %v61_v8   ;;  %74 = vperm.xlu0 %156, %v60_v9  }
  0x12   :  { %p166_p4 = pnand %p165_p3, %p159_p0 }
  0x15   :  { %101 = vperm.xlu1 %157, %v91_v10   ;;  %96 = vperm.xlu0 %156, %v90_v11  }
  0x19   :  { %111 = vperm.xlu1 %157, %v93_v12   ;;  %106 = vperm.xlu0 %156, %v92_v13  }
  0x1d   :  { %130 = vperm.xlu0 %156, %v127_v14  }
  0x84   :  { %v41_v15 = vpop.permute.xlu1 %40  ;;  %v31_v16 = vpop.permute.xlu0 %30 }
  0x85   :  { %v54_v22 = vmul.f32 %v153_v19, %v31_v16  ;;  %v56_v28 = vmul.f32 %v153_v19, %v41_v15 }
  0x88   :  { %v65_v17 = vpop.permute.xlu1 %64  ;;  %v36_v18 = vpop.permute.xlu0 %35 }
  0x89   :  { %v55_v23 = vmul.f32 %v153_v19, %v36_v18  ;;  %v82_v24 = vadd.f32 %v65_v17, %v54_v22 }
  0x8b   :  { %v86_v29 = vmax.f32 %v82_v24, 0.0 }
  0x8c   :  { %v46_v20 = vpop.permute.xlu1 %45  ;;  %v70_v21 = vpop.permute.xlu0 %69 }
  0x8d   :  { %v83_v25 = vadd.f32 %v70_v21, %v55_v23  ;;  %v57_v30 = vmul.f32 %v153_v19, %v46_v20 }
  0x8f   :  { %v87_v31 = vmax.f32 %v83_v25, 0.0 }
  0x90   :  { %v80_v26 = vpop.permute.xlu1 %79  ;;  %v75_v27 = vpop.permute.xlu0 %74 }
  0x91   :  { %v84_v32 = vadd.f32 %v75_v27, %v56_v28  ;;  %v85_v35 = vadd.f32 %v80_v26, %v57_v30 }
  0x93   :  { %v88_v38 = vmax.f32 %v84_v32, 0.0  ;;  %v89_v41 = vmax.f32 %v85_v35, 0.0 }
  0x94   :  { %v102_v33 = vpop.permute.xlu1 %101  ;;  %v97_v34 = vpop.permute.xlu0 %96 }
  0x95   :  { %v115_v36 = vmul.f32 %v102_v33, %v87_v31  ;;  %v114_v37 = vmul.f32 %v97_v34, %v86_v29 }
  0x97   :  { %v118_v42 = vadd.f32 %v115_v36, %v114_v37 }
  0x98   :  { %v112_v39 = vpop.permute.xlu1 %111  ;;  %v107_v40 = vpop.permute.xlu0 %106 }
  0x99   :  { %v116_v43 = vmul.f32 %v107_v40, %v88_v38  ;;  %v117_v44 = vmul.f32 %v112_v39, %v89_v41 }
  0x9b   :  { %v119_v45 = vadd.f32 %v118_v42, %v116_v43 }
  0x9c   :  { %v131_v54 = vpop.permute.xlu0 %130 }
  0x9d   :  { %v120_v46 = vadd.f32 %v119_v45, %v117_v44  ;;  %v136_v56 = vrot.slane %v131_v54, %v135_v52 }
  0x9f   :  { %v121_v48 = vrot.slane %v120_v46, 4 }
  0xa1   :  { %v122_v49 = vadd.f32 %v121_v48, %v120_v46 }
  0xa3   :  { %v123_v51 = vrot.slane %v122_v49, 2 }
  0xa5   :  { %v124_v53 = vadd.f32 %v123_v51, %v122_v49 }
  0xa7   :  { %v125_v55 = vrot.slane %v124_v53, 1 }
  0xa9   :  { %v126_v57 = vadd.f32 %v125_v55, %v124_v53 }
  0xab   :  { %v137_v58 = vadd.f32 %v136_v56, %v126_v57 }
  0xad   :  { %138 = vst [vmem:[#allocation3] sm:$0x1] %v137_v58 }
  0xae   :  { %169 = shalt.err (!%p166_p4)
}
  0xaf   :  { %s170_s22 = scalar_lea.hbm %s273_s5, 16 }
  0xb0   :  { %p171_p5 = scmp.ne.s32.totalorder %s273_s5, %s170_s22  ;;  %p174_p6 = scmp.lt.u32.totalorder %s170_s22, %s273_s5 }
  0xb2   :  { %p176_p7 = pnand %p174_p6, %p171_p5 }
  0xb4   :  { %179 = shalt.err (!%p176_p7)
}
  0xb5   :  { %148 = dma.vmem_to_hbm [thread:$0]  %s146_s3, 16, %s273_s5, [#allocation4]  }
  0xb6   :  { %180 = dma.done.wait [#allocation4], 16  }
  0xb7   :  { %181 = vsyncadd [#allocation4], 4294967280 }
  0xb8   :  { %152 = vsyncpa [#allocation4], 1 }

</bundles_post_ra>
